<compile_context>
chip_gen: v5e
topology: v5e:2x2
jax: 0.10.0
libtpu: 0.0.40
codegen_flags: <defaults>
</compile_context>

<pallas_src>
import functools

import jax
import jax.numpy as jnp
from jax import lax
from jax.experimental import pallas as pl
from jax.experimental.pallas import tpu as pltpu


_NEG_FILL = -1e30  # finite "minus infinity": exp underflows to exactly 0.0, bf16/f32 safe


def _round_up(x, m):
    return (x + m - 1) // m * m


def _round_down(x, m):
    return max(m, (x // m) * m)


def _num_tensorcores():
    # v7x (and v4/v5p megacore) expose 2 TensorCores per device; give the "parallel" row
    # axis at least that many tiles.  getattr keeps this a harmless no-op elsewhere.
    try:
        return max(1, int(getattr(jax.devices()[0], "num_cores", 1)))
    except Exception:
        return 1


def _ce_loss_kernel(logits_ref, targets_ref, out_ref, m_ref, l_ref, p_ref, *,
                    n_rows, n_classes):
    """One (row-tile, class-tile) grid step of cross-entropy.

    m/l/p are (tile_n, lane) PER-LANE accumulators resident across the class-tile axis:
      m: running per-lane max, l: running per-lane sum(exp(x - m)), p: gathered target logit.
    The single cross-lane (XLU) reduction happens once per row tile, in the finalize step.
    """
    i = pl.program_id(0)                    # row tile   ("parallel")
    j = pl.program_id(1)                    # class tile ("arbitrary", innermost reduction)
    tile_n, tile_c = logits_ref.shape
    lane = m_ref.shape[1]                   # 128, or tile_c when the class dim is < 128
    n_chunks = tile_c // lane
    ragged_c = (n_classes % tile_c) != 0    # trace-time: does the last class tile overhang C?

    @pl.when(j == 0)
    def _init():
        m_ref[...] = jnp.full(m_ref.shape, _NEG_FILL, m_ref.dtype)
        l_ref[...] = jnp.zeros(l_ref.shape, l_ref.dtype)
        p_ref[...] = jnp.zeros(p_ref.shape, p_ref.dtype)

    tgt = targets_ref[...]                                           # (tile_n, 1) int32
    lane_iota = lax.broadcasted_iota(jnp.int32, (tile_n, lane), 1)   # hoisted, loop-invariant
    tile_col0 = j * tile_c                                           # scalar

    # Single streaming pass over the tile in lane-width chunks (statically unrolled).
    for k in range(n_chunks):
        lo = k * lane                                                # static chunk offset
        col0 = tile_col0 + lo                                        # global col of lane 0
        x = logits_ref[:, lo:lo + lane].astype(jnp.float32)          # (tile_n, lane) f32
        if ragged_c:
            # Mask out-of-range classes BEFORE max/exp: OOB lanes of the ragged last class
            # tile hold stale VMEM (possibly NaN/Inf) and must never reach the accumulators.
            x = jnp.where(lane_iota < (n_classes - col0), x, _NEG_FILL)
        # Target gather: global col == tgt  <=>  lane_iota == tgt - col0 (no full-tile iota add).
        p_ref[...] += jnp.where(lane_iota == (tgt - col0), x, 0.0)
        # Per-lane online logsumexp update (pure VPU/EUP; no cross-lane traffic here).
        m_prev = m_ref[...]
        m_new = jnp.maximum(m_prev, x)
        l_ref[...] = l_ref[...] * jnp.exp(m_prev - m_new) + jnp.exp(x - m_new)
        m_ref[...] = m_new

    @pl.when(j == pl.num_programs(1) - 1)
    def _finalize():
        # Single cross-lane reduction per row tile.
        m_lane = m_ref[...]
        m_row = jnp.max(m_lane, axis=-1, keepdims=True)              # (tile_n, 1)
        l_row = jnp.sum(l_ref[...] * jnp.exp(m_lane - m_row), axis=-1, keepdims=True)
        p_row = jnp.sum(p_ref[...], axis=-1, keepdims=True)
        per_row = m_row + jnp.log(l_row) - p_row                     # lse - target logit
        # Rows past the true batch size (ragged last row tile) hold garbage -> mask, then sum.
        row_ids = i * tile_n + lax.broadcasted_iota(jnp.int32, (tile_n, 1), 0)
        per_row = jnp.where(row_ids < n_rows, per_row, 0.0)
        out_ref[...] = jnp.sum(per_row).reshape(1, 1, 1)


def ce_loss(logits, targets, *, max_tile_n=512, max_tile_c=4096,
            target_block_bytes=2 << 20, min_row_tiles=None, vmem_limit_bytes=None):
    """CrossEntropyLoss(logits, targets), mean reduction.  logits (N, C) float, targets (N,) int."""
    n, c = logits.shape
    itemsize = jnp.dtype(logits.dtype).itemsize
    if min_row_tiles is None:
        min_row_tiles = _num_tensorcores()

    # Class axis: lane-dense tiles (multiple of 128) via cdiv; the ragged last tile is
    # handled in-kernel, so NO wrapper-side padding / re-rounding of the logits.
    if c <= 128:
        tile_c = c                                   # block == full class dim (always legal)
    else:
        tile_c = min(_round_up(c, 128), _round_down(max_tile_c, 128))
    lane = min(tile_c, 128)

    # Row axis: sublane-aligned tiles sized so the logits block is ~target_block_bytes
    # (fits every generation's scoped-VMEM default when double-buffered).
    if n <= 8:
        tile_n = n
    else:
        by_bytes = _round_down(int(target_block_bytes // max(1, tile_c * itemsize)), 8)
        tile_n = max(8, min(_round_up(n, 8), _round_down(max_tile_n, 8), by_bytes))
    num_row_tiles = pl.cdiv(n, tile_n)
    # Make sure the "parallel" axis can actually split across the chip's TensorCores.
    if num_row_tiles < min_row_tiles and n > 8:
        tile_n = max(8, _round_up(pl.cdiv(n, min_row_tiles), 8))
        num_row_tiles = pl.cdiv(n, tile_n)
    num_col_tiles = pl.cdiv(c, tile_c)
    assert tile_c % lane == 0

    # Raise the scoped-VMEM limit only when the requested blocks actually need it (big
    # v7x-style tiles); the ~2 MiB defaults stay under every generation's scoped default.
    if vmem_limit_bytes is None:
        block_bytes = tile_n * tile_c * itemsize
        est = 2 * block_bytes + 16 * tile_n * max(lane, 128) * 4 + (2 << 20)
        if est > (12 << 20):
            vmem_limit_bytes = int(min(max(2 * est, 32 << 20), 100 << 20))

    x = logits                                       # native dtype; bf16 stays bf16 in HBM
    t = targets.astype(jnp.int32).reshape(n, 1)

    kernel = functools.partial(_ce_loss_kernel, n_rows=n, n_classes=c)

    partial_sums = pl.pallas_call(
        kernel,
        out_shape=jax.ShapeDtypeStruct((num_row_tiles, 1, 1), jnp.float32),
        grid_spec=pltpu.PrefetchScalarGridSpec(
            num_scalar_prefetch=0,
            grid=(num_row_tiles, num_col_tiles),
            in_specs=[
                pl.BlockSpec((tile_n, tile_c), lambda i, j: (i, j)),
                pl.BlockSpec((tile_n, 1), lambda i, j: (i, 0)),
            ],
            out_specs=pl.BlockSpec((1, 1, 1), lambda i, j: (i, 0, 0)),
            scratch_shapes=[
                pltpu.VMEM((tile_n, lane), jnp.float32),   # per-lane running max
                pltpu.VMEM((tile_n, lane), jnp.float32),   # per-lane running sum-exp
                pltpu.VMEM((tile_n, lane), jnp.float32),   # per-lane gathered target logit
            ],
        ),
        compiler_params=pltpu.CompilerParams(
            dimension_semantics=("parallel", "arbitrary"),
            vmem_limit_bytes=vmem_limit_bytes),
    )(x, t)

    return jnp.sum(partial_sums) / n


if __name__ == "__main__":
    key = jax.random.PRNGKey(0)

    def ref_ce(logits, targets):
        lp = jax.nn.log_softmax(logits.astype(jnp.float32), axis=1)
        return -jnp.mean(jnp.take_along_axis(lp, targets[:, None], axis=1))

    k1, k2, k3, k4, k5, k6 = jax.random.split(key, 6)

    # 1) tiny shape from the module spec (batch=8, classes=32): single block, class dim < 128.
    logits = jax.random.normal(k1, (8, 32), dtype=jnp.float32)
    targets = jax.random.randint(k2, (8,), 0, 32, dtype=jnp.int32)
    out = jax.block_until_ready(ce_loss(logits, targets))
    ref = ref_ce(logits, targets)
    assert jnp.allclose(out, ref, atol=1e-5), (out, ref)

    # 2) forced multi-tile grid: online accumulation across class tiles, per-row-tile partial
    #    sums, ragged last row tile (N=20 with tile_n=16) and padded-row masking.
    logits2 = jax.random.normal(k3, (20, 256), dtype=jnp.float32)
    targets2 = jax.random.randint(k4, (20,), 0, 256, dtype=jnp.int32)
    out2 = jax.block_until_ready(ce_loss(logits2, targets2, max_tile_n=16, max_tile_c=128))
    ref2 = ref_ce(logits2, targets2)
    assert jnp.allclose(out2, ref2, atol=1e-5), (out2, ref2)

    # 3) ragged class tile (C=200 -> tile_c=256, in-kernel column mask, no wrapper pad) plus
    #    a forced 2-way row split (megacore path) with a ragged last row tile (N=13).
    logits3 = jax.random.normal(k5, (13, 200), dtype=jnp.float32)
    targets3 = jax.random.randint(k6, (13,), 0, 200, dtype=jnp.int32)
    out3 = jax.block_until_ready(ce_loss(logits3, targets3, min_row_tiles=2))
    ref3 = ref_ce(logits3, targets3)
    assert jnp.allclose(out3, ref3, atol=1e-5), (out3, ref3)

    # 4) bf16 logits pass through in native dtype (no wrapper upcast); compute is f32 in-kernel.
    logits4 = logits2.astype(jnp.bfloat16)
    out4 = jax.block_until_ready(ce_loss(logits4, targets2))
    ref4 = ref_ce(logits4, targets2)
    assert jnp.allclose(out4, ref4, atol=1e-4), (out4, ref4)

    print("KERNEL_OK")
</pallas_src>

<mosaic_0001>
module attributes {stable_mosaic.version = 11 : i64} {
  func.func @_ce_loss_kernel(%arg0: i32, %arg1: i32, %arg2: memref<8x32xf32, #tpu.memory_space<vmem>>, %arg3: memref<8x1xi32, #tpu.memory_space<vmem>>, %arg4: memref<1x1x1xf32, #tpu.memory_space<vmem>>, %arg5: memref<8x32xf32, #tpu.memory_space<vmem>>, %arg6: memref<8x32xf32, #tpu.memory_space<vmem>>, %arg7: memref<8x32xf32, #tpu.memory_space<vmem>>) attributes {dimension_semantics = [#tpu.dimension_semantics<parallel>, #tpu.dimension_semantics<arbitrary>], iteration_bounds = array<i64: 1, 1>, scalar_prefetch = 0 : i64, scratch_operands = 3 : i64, tpu.core_type = #tpu.core_type<tc>, window_params = [{transform_indices = @transform_0, window_bounds = array<i64: 8, 32>}, {transform_indices = @transform_1, window_bounds = array<i64: 8, 1>}, {transform_indices = @transform_2, window_bounds = array<i64: 1, 1, 1>}]} {
    %c0_i32 = arith.constant 0 : i32
    %0 = arith.cmpi eq, %arg1, %c0_i32 : i32
    %1 = arith.extui %0 : i1 to i32
    %c0_i32_0 = arith.constant 0 : i32
    %2 = arith.cmpi ne, %1, %c0_i32_0 : i32
    scf.if %2 {
      %cst_19 = arith.constant -1.000000e+30 : f32
      %31 = vector.broadcast %cst_19 : f32 to vector<8x32xf32>
      %c0_20 = arith.constant 0 : index
      %c0_21 = arith.constant 0 : index
      %32 = vector.load %arg5[%c0_20, %c0_21] : memref<8x32xf32, #tpu.memory_space<vmem>>, vector<8x32xf32>
      tpu.vector_store %arg5[%c0_20, %c0_21], %31 {strides = array<i32>} : memref<8x32xf32, #tpu.memory_space<vmem>>, vector<8x32xf32>,
      %cst_22 = arith.constant 0.000000e+00 : f32
      %33 = vector.broadcast %cst_22 : f32 to vector<8x32xf32>
      %c0_23 = arith.constant 0 : index
      %c0_24 = arith.constant 0 : index
      %34 = vector.load %arg6[%c0_23, %c0_24] : memref<8x32xf32, #tpu.memory_space<vmem>>, vector<8x32xf32>
      tpu.vector_store %arg6[%c0_23, %c0_24], %33 {strides = array<i32>} : memref<8x32xf32, #tpu.memory_space<vmem>>, vector<8x32xf32>,
      %cst_25 = arith.constant 0.000000e+00 : f32
      %35 = vector.broadcast %cst_25 : f32 to vector<8x32xf32>
      %c0_26 = arith.constant 0 : index
      %c0_27 = arith.constant 0 : index
      %36 = vector.load %arg7[%c0_26, %c0_27] : memref<8x32xf32, #tpu.memory_space<vmem>>, vector<8x32xf32>
      tpu.vector_store %arg7[%c0_26, %c0_27], %35 {strides = array<i32>} : memref<8x32xf32, #tpu.memory_space<vmem>>, vector<8x32xf32>,
    } else {
    }
    %c0 = arith.constant 0 : index
    %c0_1 = arith.constant 0 : index
    %3 = vector.load %arg3[%c0, %c0_1] : memref<8x1xi32, #tpu.memory_space<vmem>>, vector<8x1xi32>
    %4 = tpu.iota {dimensions = array<i32: 1>} : vector<8x32xi32>
    %c32_i32 = arith.constant 32 : i32
    %5 = arith.muli %arg1, %c32_i32 : i32
    %c0_i32_2 = arith.constant 0 : i32
    %6 = arith.addi %5, %c0_i32_2 : i32
    %c0_3 = arith.constant 0 : index
    %c0_4 = arith.constant 0 : index
    %7 = vector.load %arg2[%c0_3, %c0_4] : memref<8x32xf32, #tpu.memory_space<vmem>>, vector<8x32xf32>
    %c0_5 = arith.constant 0 : index
    %c0_6 = arith.constant 0 : index
    %8 = vector.load %arg7[%c0_5, %c0_6] : memref<8x32xf32, #tpu.memory_space<vmem>>, vector<8x32xf32>
    %9 = vector.broadcast %6 : i32 to vector<8x1xi32>
    %10 = arith.subi %3, %9 : vector<8x1xi32>
    %11 = vector.broadcast %10 : vector<8x1xi32> to vector<8x32xi32>
    %12 = arith.cmpi eq, %4, %11 : vector<8x32xi32>
    %cst = arith.constant 0.000000e+00 : f32
    %13 = vector.broadcast %cst : f32 to vector<8x32xf32>
    %14 = arith.select %12, %7, %13 : vector<8x32xi1>, vector<8x32xf32>
    %15 = arith.addf %8, %14 : vector<8x32xf32>
    %c0_7 = arith.constant 0 : index
    %c0_8 = arith.constant 0 : index
    %16 = vector.load %arg7[%c0_7, %c0_8] : memref<8x32xf32, #tpu.memory_space<vmem>>, vector<8x32xf32>
    tpu.vector_store %arg7[%c0_7, %c0_8], %15 {strides = array<i32>} : memref<8x32xf32, #tpu.memory_space<vmem>>, vector<8x32xf32>,
    %c0_9 = arith.constant 0 : index
    %c0_10 = arith.constant 0 : index
    %17 = vector.load %arg5[%c0_9, %c0_10] : memref<8x32xf32, #tpu.memory_space<vmem>>, vector<8x32xf32>
    %18 = arith.maximumf %17, %7 : vector<8x32xf32>
    %c0_11 = arith.constant 0 : index
    %c0_12 = arith.constant 0 : index
    %19 = vector.load %arg6[%c0_11, %c0_12] : memref<8x32xf32, #tpu.memory_space<vmem>>, vector<8x32xf32>
    %20 = arith.subf %17, %18 : vector<8x32xf32>
    %21 = math.exp %20 : vector<8x32xf32>
    %22 = arith.mulf %19, %21 : vector<8x32xf32>
    %23 = arith.subf %7, %18 : vector<8x32xf32>
    %24 = math.exp %23 : vector<8x32xf32>
    %25 = arith.addf %22, %24 : vector<8x32xf32>
    %c0_13 = arith.constant 0 : index
    %c0_14 = arith.constant 0 : index
    %26 = vector.load %arg6[%c0_13, %c0_14] : memref<8x32xf32, #tpu.memory_space<vmem>>, vector<8x32xf32>
    tpu.vector_store %arg6[%c0_13, %c0_14], %25 {strides = array<i32>} : memref<8x32xf32, #tpu.memory_space<vmem>>, vector<8x32xf32>,
    %c0_15 = arith.constant 0 : index
    %c0_16 = arith.constant 0 : index
    %27 = vector.load %arg5[%c0_15, %c0_16] : memref<8x32xf32, #tpu.memory_space<vmem>>, vector<8x32xf32>
    tpu.vector_store %arg5[%c0_15, %c0_16], %18 {strides = array<i32>} : memref<8x32xf32, #tpu.memory_space<vmem>>, vector<8x32xf32>,
    %c0_i32_17 = arith.constant 0 : i32
    %28 = arith.cmpi eq, %arg1, %c0_i32_17 : i32
    %29 = arith.extui %28 : i1 to i32
    %c0_i32_18 = arith.constant 0 : i32
    %30 = arith.cmpi ne, %29, %c0_i32_18 : i32
    scf.if %30 {
      %c0_19 = arith.constant 0 : index
      %c0_20 = arith.constant 0 : index
      %31 = vector.load %arg5[%c0_19, %c0_20] : memref<8x32xf32, #tpu.memory_space<vmem>>, vector<8x32xf32>
      %cst_21 = arith.constant dense<0xFF800000> : vector<8xf32>
      %32 = vector.multi_reduction <maximumf>, %31, %cst_21 [1] : vector<8x32xf32> to vector<8xf32>
      %33 = vector.shape_cast %32 : vector<8xf32> to vector<8x1xf32>
      %c0_22 = arith.constant 0 : index
      %c0_23 = arith.constant 0 : index
      %34 = vector.load %arg6[%c0_22, %c0_23] : memref<8x32xf32, #tpu.memory_space<vmem>>, vector<8x32xf32>
      %35 = vector.broadcast %33 : vector<8x1xf32> to vector<8x32xf32>
      %36 = arith.subf %31, %35 : vector<8x32xf32>
      %37 = math.exp %36 : vector<8x32xf32>
      %38 = arith.mulf %34, %37 : vector<8x32xf32>
      %cst_24 = arith.constant dense<0.000000e+00> : vector<8xf32>
      %39 = vector.multi_reduction <add>, %38, %cst_24 [1] : vector<8x32xf32> to vector<8xf32>
      %40 = vector.shape_cast %39 : vector<8xf32> to vector<8x1xf32>
      %c0_25 = arith.constant 0 : index
      %c0_26 = arith.constant 0 : index
      %41 = vector.load %arg7[%c0_25, %c0_26] : memref<8x32xf32, #tpu.memory_space<vmem>>, vector<8x32xf32>
      %cst_27 = arith.constant dense<0.000000e+00> : vector<8xf32>
      %42 = vector.multi_reduction <add>, %41, %cst_27 [1] : vector<8x32xf32> to vector<8xf32>
      %43 = vector.shape_cast %42 : vector<8xf32> to vector<8x1xf32>
      %44 = math.log %40 : vector<8x1xf32>
      %45 = arith.addf %33, %44 : vector<8x1xf32>
      %46 = arith.subf %45, %43 : vector<8x1xf32>
      %c8_i32 = arith.constant 8 : i32
      %47 = arith.muli %arg0, %c8_i32 : i32
      %48 = tpu.iota {dimensions = array<i32: 0>} : vector<8x1xi32>
      %49 = vector.broadcast %47 : i32 to vector<8x1xi32>
      %50 = arith.addi %49, %48 : vector<8x1xi32>
      %c8_i32_28 = arith.constant 8 : i32
      %51 = vector.broadcast %c8_i32_28 : i32 to vector<8x1xi32>
      %52 = arith.cmpi slt, %50, %51 : vector<8x1xi32>
      %cst_29 = arith.constant 0.000000e+00 : f32
      %53 = vector.broadcast %cst_29 : f32 to vector<8x1xf32>
      %54 = arith.select %52, %46, %53 : vector<8x1xi1>, vector<8x1xf32>
      %55 = vector.shape_cast %54 : vector<8x1xf32> to vector<1x8x1xf32>
      %cst_30 = arith.constant dense<0.000000e+00> : vector<1xf32>
      %56 = vector.multi_reduction <add>, %55, %cst_30 [1, 2] : vector<1x8x1xf32> to vector<1xf32>
      %57 = vector.shape_cast %56 : vector<1xf32> to vector<1x1x1xf32>
      %58 = vector.extract %57[0, 0, 0] : f32 from vector<1x1x1xf32>
      %59 = vector.broadcast %58 : f32 to vector<1x1x1xf32>
      %c0_31 = arith.constant 0 : index
      %c0_32 = arith.constant 0 : index
      %c0_33 = arith.constant 0 : index
      %60 = vector.load %arg4[%c0_31, %c0_32, %c0_33] : memref<1x1x1xf32, #tpu.memory_space<vmem>>, vector<1x1x1xf32>
      tpu.vector_store %arg4[%c0_31, %c0_32, %c0_33], %59 {strides = array<i32>} : memref<1x1x1xf32, #tpu.memory_space<vmem>>, vector<1x1x1xf32>,
    } else {
    }
    return
  }
  func.func @transform_0(%arg0: i32, %arg1: i32) -> (i32, i32) {
    %c0_i32 = arith.constant 0 : i32
    return %arg0, %arg1 : i32, i32
  }
  func.func @transform_1(%arg0: i32, %arg1: i32) -> (i32, i32) {
    %c0_i32 = arith.constant 0 : i32
    %c0_i32_0 = arith.constant 0 : i32
    return %arg0, %c0_i32 : i32, i32
  }
  func.func @transform_2(%arg0: i32, %arg1: i32) -> (i32, i32, i32) {
    %c0_i32 = arith.constant 0 : i32
    %c0_i32_0 = arith.constant 0 : i32
    %c0_i32_1 = arith.constant 0 : i32
    return %arg0, %c0_i32, %c0_i32_0 : i32, i32, i32
  }
}

</mosaic_0001>

<bundles_post_ra>
// kernel: tpu_custom_call.1
= control target key start
LH: loop header
LB: loop body
LE: loop exit
PB: predicated region body
PF: predicated region fallthrough
CT: control target
= control target key end

     0   :  { %vm16_vm0 = vcmask 261120   ;;  %v150_v0 = vmov -1e+30   ;;  %v151_v1 = vmov 0   ;;  %s187_s0 = inlined_call_operand.vmem [shape: f32[8,32], index: 0, kind: input, shape index: {}]   ;;  %s188_s1 = inlined_call_operand.vmem [shape: s32[8,1], index: 1, kind: input, shape index: {}]   ;;  %s189_s2 = inlined_call_operand.hbm [shape: f32[1,1,1], index: 2, kind: output, shape index: {}]  }
   0x1   :  { %17 = vst.msk [vmem:[#allocation2] sm:$0xff] %vm16_vm0, %v150_v0  ;;  %115 = vset.pattern.permute.xlu0 %v151_v1 }
   0x2   :  { %7 = vsyncpa [#allocation6], 0  ;;  %v24_v2 = vld [vmem:[%s187_s0] sm:$0xff]  ;;  %v152_v12 = vmov 0.0   ;;  %v21_v24 = vlaneseq  ;;  %vm79_vm2 = vcmask 7168   ;;  %s153_s0 = smov [#allocation5]  }
   0x3   :  { %v20_v8 = vld [vmem:[%s188_s1] sm:$0xff]  ;;  %18 = vst.msk [vmem:[#allocation3] sm:$0xff] %vm16_vm0, %v152_v12  ;;  %s98_s1 = sshll.u32 %s153_s0, 4  ;;  %s100_s15 = sshll.u32 %s189_s2, 4  ;;  %vm91_vm3 = vcmask 0   ;;  %s99_s1 = int_to_ptr.vmem [resolvable:$true] %s98_s1  ;;  %s101_s15 = int_to_ptr.hbm [resolvable:$true] %s100_s15 }
   0x4   :  { %19 = vst.msk [vmem:[#allocation4] sm:$0xff] %vm16_vm0, %v152_v12  ;;  %v22_v26 = vand.u32 127, %v21_v24 }
   0x8   :  { %v36_v3 = vld [vmem:[#allocation2] sm:$0xff] }
   0x9   :  { %v37_v4 = vmax.f32 %v36_v3, %v24_v2 }
   0xa   :  { %v38_v15 = vld [vmem:[#allocation3] sm:$0xff] }
   0xb   :  { %48 = vst.msk [vmem:[#allocation2] sm:$0xff] %vm16_vm0, %v37_v4  ;;  %v39_v5 = vsub.f32 %v36_v3, %v37_v4  ;;  %v43_v9 = vsub.f32 %v24_v2, %v37_v4  ;;  %v25_v27 = vld [vmem:[#allocation4] sm:$0xff] }
   0xd   :  { %v40_v10 = vmul.f32 1.442695, %v39_v5  ;;  %v44_v11 = vmul.f32 1.442695, %v43_v9 }
   0xf   :  { %116 = vpow2.f32 %v40_v10 }
  0x10   :  { %118 = vpow2.f32 %v44_v11 }
  0x12   :  { %v52_v6 = vld [vmem:[#allocation2] sm:$0xff] }
  0x13   :  { %v53_v7 = vsel %vm16_vm0, %v52_v6, -inf }
  0x14   :  { %54 = vmax.xlane.f32.xlu0 %v53_v7 }
  0x15   :  { %v117_v13 = vpop.eup %116 }
  0x16   :  { %v119_v14 = vpop.eup %118  ;;  %v42_v16 = vmul.f32 %v117_v13, %v38_v15 }
  0x18   :  { %v46_v17 = vadd.f32 %v119_v14, %v42_v16 }
  0x1a   :  { %47 = vst.msk [vmem:[#allocation3] sm:$0xff] %vm16_vm0, %v46_v17 }
  0x21   :  { %v56_v21 = vld [vmem:[#allocation3] sm:$0xff] }
  0x28   :  { %29 = vperm.xlu0 %115, %v20_v8  }
  0x87   :  { %v55_v18 = vpop.xlane.xlu0 %54 }
  0x88   :  { %v57_v19 = vsub.f32 %v52_v6, %v55_v18 }
  0x8a   :  { %v58_v20 = vmul.f32 1.442695, %v57_v19 }
  0x8c   :  { %120 = vpow2.f32 %v58_v20 }
  0x92   :  { %v121_v22 = vpop.eup %120 }
  0x93   :  { %v60_v23 = vmul.f32 %v121_v22, %v56_v21 }
  0x95   :  { %v61_v25 = vsel %vm16_vm0, %v60_v23, 0.0 }
  0x96   :  { %62 = vadd.xlane.f32.xlu1 %v61_v25 }
  0x9a   :  { %v30_v28 = vpop.permute.xlu0 %29 }
  0x9b   :  { %vm31_vm1 = vcmp.eq.s32.totalorder %v22_v26, %v30_v28 }
  0x9c   :  { %v32_v29 = vsel %vm31_vm1, %v24_v2, 0.0 }
  0x9d   :  { %v33_v30 = vadd.f32 %v32_v29, %v25_v27 }
  0x9f   :  { %35 = vst.msk [vmem:[#allocation4] sm:$0xff] %vm16_vm0, %v33_v30 }
  0xa6   :  { %v64_v31 = vld [vmem:[#allocation4] sm:$0xff] }
  0xa7   :  { %v65_v32 = vsel %vm16_vm0, %v64_v31, 0.0 }
  0xa8   :  { %66 = vadd.xlane.f32.xlu1 %v65_v32 }
 0x109   :  { %v63_v33 = vpop.xlane.xlu1 %62 }
 0x10a   :  { %122 = vlog2.f32 %v63_v33 }
 0x110   :  { %v123_v34 = vpop.eup %122 }
 0x111   :  { %v69_v35 = vmul.f32 0.6931472, %v123_v34 }
 0x113   :  { %v70_v36 = vadd.f32 %v69_v35, %v55_v18 }
 0x11b   :  { %v67_v37 = vpop.xlane.xlu1 %66 }
 0x11c   :  { %v71_v38 = vsub.f32 %v70_v36, %v67_v37 }
 0x11e   :  { %v80_v39 = vsel %vm79_vm2, %v71_v38, 0.0 }
 0x11f   :  { %81 = vadd.xlane.f32.xlu2 %v80_v39 }
 0x192   :  { %v82_v40 = vpop.xlane.xlu2 %81 }
 0x193   :  { %v83_v41 = vrot.slane %v82_v40, 4 }
 0x195   :  { %v84_v42 = vadd.f32 %v83_v41, %v82_v40 }
 0x197   :  { %v85_v43 = vrot.slane %v84_v42, 2 }
 0x199   :  { %v86_v44 = vadd.f32 %v85_v43, %v84_v42 }
 0x19b   :  { %v87_v45 = vrot.slane %v86_v44, 1 }
 0x19d   :  { %v88_v46 = vadd.f32 %v87_v45, %v86_v44 }
 0x19f   :  { %109 = vpush %v88_v46 }
 0x1d0   :  { %s110_s16 = spop %109 }
 0x1d1   :  { %v90_v47 = vstv %s110_s16 }
 0x1d2   :  { %92 = vst.msk [vmem:[#allocation5] sm:$0x1] %vm91_vm3, %v90_v47 }
 0x1d3   :  { %103 = dma.vmem_to_hbm [thread:$0]  %s99_s1, 16, %s101_s15, [#allocation6]  }
 0x1d4   :  { %148 = dma.done.wait [#allocation6], 16  }
 0x1d5   :  { %149 = vsyncadd [#allocation6], 4294967280 }
 0x1d6   :  { %108 = vsyncpa [#allocation6], 1 }

</bundles_post_ra>
